<compile_context>
chip_gen: v5e
topology: v5e:2x2
jax: 0.10.0
libtpu: 0.0.40
codegen_flags: <defaults>
</compile_context>

<pallas_src>
import jax
import jax.numpy as jnp
from jax.experimental import pallas as pl
from jax.experimental.pallas import tpu as pltpu

LANE = 128
SUBLANE = 8


def _round_up(x, m):
    return ((x + m - 1) // m) * m


def _cdiv(a, b):
    return -(-a // b)


# ---------------------------------------------------------------------------
# Offline parameter preparation:
#   * fold frozen branch Linears into head[0] (exact, K-split),
#   * fold head[-1] into fc (exact: no activation between them),
#   * pad every width to a 128-lane multiple (exact: zero rows/cols),
#   * cast matmul weights to bf16 (set mxu_dtype=jnp.float32 if the 2-logit
#     margins need full precision; the f32 MXU passes are hidden under DMA
#     for f32 inputs), biases stay f32,
#   * pack tail weights / biases into contiguous VMEM-resident buffers.
# ---------------------------------------------------------------------------
def prepare_params(params, mxu_dtype=jnp.bfloat16):
    w_img, b_img = params["image_branch"]
    w_nrm, b_nrm = params["norm_branch"]
    w_h, b_h = params["H_branch"]
    head = params["head"]                    # list of (w, b), w: (din, dout)
    w_fc, b_fc = params["fc"]

    f_img, f_nrm = w_img.shape[1], w_nrm.shape[1]
    hidden = [w.shape[1] for (w, _) in head]
    L = len(hidden)
    out_features = w_fc.shape[1]

    # ---- fold frozen branch Linears into the first head Linear (exact) ----
    w1, b1 = head[0]
    w1_img = w1[:f_img]
    w1_nrm = w1[f_img:f_img + f_nrm]
    w1_h = w1[f_img + f_nrm:]
    wf_img = w_img @ w1_img                                    # (D_img, H0)
    wf_nrm = w_nrm @ w1_nrm                                    # (D_nrm, H0)
    wf_h = w_h @ w1_h                                          # (D_h,  H0)
    bf0 = b_img @ w1_img + b_nrm @ w1_nrm + b_h @ w1_h + b1    # (1, H0)

    hp = [_round_up(h, LANE) for h in hidden]
    outp = _round_up(out_features, LANE)

    def pad2(a, r, c):
        return jnp.pad(a, ((0, r - a.shape[0]), (0, c - a.shape[1])))

    wf_img_p = pad2(wf_img, wf_img.shape[0], hp[0]).astype(mxu_dtype)
    wf_nrm_p = pad2(wf_nrm, wf_nrm.shape[0], hp[0]).astype(mxu_dtype)
    wf_h_p = pad2(wf_h, wf_h.shape[0], hp[0]).astype(mxu_dtype)

    # ---- tail layers: head[1..L-2] (ReLU after each), then head[L-1] folded
    #      with fc (no activation between them in torchvision MLP; dropout is
    #      identity at inference, so the fold is exact) ----
    tail_layers = []                         # (w, b, Kpad, Npad)
    if L >= 2:
        for i in range(1, L - 1):
            tail_layers.append((head[i][0], head[i][1], hp[i - 1], hp[i]))
        w_last = head[L - 1][0] @ w_fc                          # (H_{L-2}, out)
        b_last = head[L - 1][1] @ w_fc + b_fc
        tail_layers.append((w_last, b_last, hp[L - 2], outp))
    else:
        tail_layers.append((w_fc, b_fc, hp[0], outp))

    cmax_w = max(np_ for (_, _, _, np_) in tail_layers)
    tail_specs, tail_blocks, row = [], [], 0
    for (w, _, kp, np_) in tail_layers:
        tail_blocks.append(pad2(w, kp, cmax_w))
        tail_specs.append((row, kp, np_))
        row += kp
    tail_w = jnp.concatenate(tail_blocks, axis=0).astype(mxu_dtype)

    # ---- pack biases (folded b0, then one per tail layer) in f32 ----
    cmax_b = max([hp[0]] + [np_ for (_, _, _, np_) in tail_layers])
    b_rows = [pad2(bf0, 1, cmax_b)]
    for (_, b, _, np_) in tail_layers:
        b_rows.append(pad2(b, 1, cmax_b))
    biases = jnp.concatenate(b_rows, axis=0)
    biases = jnp.pad(
        biases, ((0, _round_up(biases.shape[0], SUBLANE) - biases.shape[0]),
                 (0, 0))).astype(jnp.float32)

    packed = dict(wf_img=wf_img_p, wf_nrm=wf_nrm_p, wf_h=wf_h_p,
                  tail_w=tail_w, biases=biases)
    meta = dict(hp=tuple(hp), outp=outp, out_features=out_features, L=L,
                tail=tuple(tail_specs), mxu_dtype=mxu_dtype)
    return packed, meta


# ---------------------------------------------------------------------------
# Fused forward kernel: folded first layer (K-split over the 3 inputs, no
# concat) -> middle head Linears (ReLU) -> folded (head[-1] @ fc) Linear.
# MXU operands in mxu_dtype, accumulation + bias/ReLU in f32, bf16 store.
# ---------------------------------------------------------------------------
def _make_fused_kernel(meta):
    hp, L, tail = meta["hp"], meta["L"], meta["tail"]
    mdt, f32 = meta["mxu_dtype"], jnp.float32

    def kernel(xi_ref, xn_ref, xh_ref, wi_ref, wn_ref, wh_ref,
               tw_ref, b_ref, o_ref):
        h = (jnp.dot(xi_ref[...].astype(mdt), wi_ref[...],
                     preferred_element_type=f32)
             + jnp.dot(xn_ref[...].astype(mdt), wn_ref[...],
                       preferred_element_type=f32)
             + jnp.dot(xh_ref[...].astype(mdt), wh_ref[...],
                       preferred_element_type=f32)
             + b_ref[0:1, 0:hp[0]])
        if L > 1:
            h = jnp.maximum(h, 0.0)                 # ReLU (f32 VPU)
        # TODO(synk): dropout (p=0.4) is inference-mode identity; not implemented.
        n_tail = len(tail)
        for idx, (row, kp, np_) in enumerate(tail):
            w = tw_ref[row:row + kp, 0:np_]         # static, 128-aligned slice
            bias = b_ref[idx + 1:idx + 2, 0:np_]
            h = jnp.dot(h.astype(mdt), w, preferred_element_type=f32) + bias
            if idx < n_tail - 1:                    # ReLU on all but last tail layer
                h = jnp.maximum(h, 0.0)
        o_ref[...] = h.astype(o_ref.dtype)          # lane-dense bf16 store

    return kernel


def _vmem_capacity_bytes():
    try:
        return int(pltpu.get_tpu_info().vmem_capacity_bytes)
    except Exception:
        return 64 * 1024 * 1024   # conservative fallback: v7x-class per-TC VMEM


# ---------------------------------------------------------------------------
# Full StainFusionModule forward (single pallas_call)
# ---------------------------------------------------------------------------
def stain_fusion_forward(images, norms, Hs, packed, meta, *, tile_n=4096):
    def flat(x):
        # Frozen branches run under torch.no_grad() -> stop_gradient.
        # Inputs should arrive in bf16 from the producer for the HBM win;
        # f32 also works (cast is done in-kernel, never as a wrapper pass).
        return jax.lax.stop_gradient(x.reshape(x.shape[0], -1))

    xi, xn, xh = flat(images), flat(norms), flat(Hs)
    n = xi.shape[0]
    d_img, d_nrm, d_h = xi.shape[1], xn.shape[1], xh.shape[1]
    d_total = d_img + d_nrm + d_h
    outp = meta["outp"]
    out_dtype = jnp.bfloat16                  # halves writeback of padded logits

    # ---- generation-aware tile / VMEM budget ------------------------------
    vmem_cap = _vmem_capacity_bytes()
    big_vmem = vmem_cap >= 100 * 1024 * 1024            # v5e / v6e (128 MiB)
    budget = (72 if big_vmem else 44) * 1024 * 1024     # vmem_limit_bytes
    gen_max_tile = 4096 if big_vmem else 1536           # v7x: smaller VMEM
    two_core_hint = not big_vmem                        # v7x: 2 TCs per chip

    mxu_itemsize = packed["wf_img"].dtype.itemsize
    in_row_bytes = d_total * xi.dtype.itemsize          # double-buffered inputs
    out_row_bytes = outp * 2                             # bf16 output, dbl-buf
    cast_row_bytes = d_total * mxu_itemsize if xi.dtype != packed["wf_img"].dtype else 0
    inter_row_bytes = 6 * max(max(meta["hp"]), outp) * 4  # f32 temporaries
    per_row = 2 * in_row_bytes + 2 * out_row_bytes + cast_row_bytes + inter_row_bytes
    weight_bytes = 2 * sum(int(a.size) * a.dtype.itemsize for a in packed.values())
    avail = max(budget - weight_bytes - 4 * 1024 * 1024, SUBLANE * per_row)
    row_cap = max(SUBLANE, (avail // per_row) // SUBLANE * SUBLANE)

    max_tile = max(SUBLANE, min(tile_n, gen_max_tile, row_cap))
    num_tiles = max(1, _cdiv(n, max_tile))               # balanced vs batch
    if two_core_hint and n > SUBLANE:
        num_tiles = max(2, num_tiles + (num_tiles % 2))  # even grid >= 2 -> both TCs
    tn = _round_up(_cdiv(n, num_tiles), SUBLANE)
    n_pad = num_tiles * tn
    if n_pad != n:
        pad = ((0, n_pad - n), (0, 0))
        xi, xn, xh = jnp.pad(xi, pad), jnp.pad(xn, pad), jnp.pad(xh, pad)

    kernel = _make_fused_kernel(meta)

    def x_spec(d):
        return pl.BlockSpec((tn, d), lambda i: (i, 0))

    def resident(a):
        # Constant index_map: fetched once, stays resident in VMEM.
        # (pl.Buffered(1) would drop the unused second buffer of each weight,
        #  but the chosen tiles already leave ample VMEM headroom.)
        return pl.BlockSpec(a.shape, lambda i: (0, 0))

    out = pl.pallas_call(
        kernel,
        out_shape=jax.ShapeDtypeStruct((n_pad, outp), out_dtype),
        grid_spec=pltpu.PrefetchScalarGridSpec(
            num_scalar_prefetch=0,
            grid=(num_tiles,),
            in_specs=[x_spec(d_img), x_spec(d_nrm), x_spec(d_h),
                      resident(packed["wf_img"]),
                      resident(packed["wf_nrm"]),
                      resident(packed["wf_h"]),
                      resident(packed["tail_w"]),
                      resident(packed["biases"])],
            out_specs=pl.BlockSpec((tn, outp), lambda i: (i, 0)),
        ),
        compiler_params=pltpu.CompilerParams(
            dimension_semantics=("parallel",),   # shards batch over 2 TCs on v7x
            vmem_limit_bytes=budget),
    )(xi, xn, xh, packed["wf_img"], packed["wf_nrm"], packed["wf_h"],
      packed["tail_w"], packed["biases"])

    # Slice off the batch / lane padding; return f32 logits like the module.
    return out[:n, :meta["out_features"]].astype(jnp.float32)


# ---------------------------------------------------------------------------
# Deterministic parameter init (PyTorch Linear-style uniform), and a pure-JAX
# f32 reference of the original (unfolded) module for a sanity check.
# ---------------------------------------------------------------------------
def init_params(key, img_shape, norm_shape, h_shape,
                img_feat=32, norm_feat=32, h_feat=16,
                hidden_sizes=(64, 64, 32), out_features=2):
    def linear(k, din, dout):
        kw, kb = jax.random.split(k)
        scale = 1.0 / float(din) ** 0.5
        w = jax.random.uniform(kw, (din, dout), jnp.float32, -scale, scale)
        b = jax.random.uniform(kb, (1, dout), jnp.float32, -scale, scale)
        return w, b

    keys = jax.random.split(key, 4 + len(hidden_sizes))
    d_img = img_shape[1] * img_shape[2] * img_shape[3]
    d_nrm = norm_shape[1] * norm_shape[2] * norm_shape[3]
    d_h = h_shape[1] * h_shape[2] * h_shape[3]

    params = {
        "image_branch": linear(keys[0], d_img, img_feat),
        "norm_branch": linear(keys[1], d_nrm, norm_feat),
        "H_branch": linear(keys[2], d_h, h_feat),
    }
    head, din = [], img_feat + norm_feat + h_feat
    for i, hsz in enumerate(hidden_sizes):
        head.append(linear(keys[3 + i], din, hsz))
        din = hsz
    params["head"] = head
    params["fc"] = linear(keys[3 + len(hidden_sizes)], din, out_features)
    return params


def reference_forward(images, norms, Hs, params):
    def flat(x):
        return x.reshape(x.shape[0], -1)

    def lin(x, wb):
        return x @ wb[0] + wb[1]

    e = jnp.concatenate([lin(flat(images), params["image_branch"]),
                         lin(flat(norms), params["norm_branch"]),
                         lin(flat(Hs), params["H_branch"])], axis=1)
    h, L = e, len(params["head"])
    for i, wb in enumerate(params["head"]):
        h = lin(h, wb)
        if i < L - 1:                # torchvision MLP: no act after last layer
            h = jnp.maximum(h, 0.0)
    return lin(h, params["fc"])


if __name__ == "__main__":
    key = jax.random.PRNGKey(0)
    k_img, k_nrm, k_h, k_par = jax.random.split(key, 4)

    # small shapes: batch=2, RGB 16x16 image/norm branches, 1-channel H map.
    # Inputs are produced in bf16 at the source (halves kernel HBM reads).
    images = jax.random.normal(k_img, (2, 3, 16, 16), jnp.bfloat16)   # NCHW
    norms = jax.random.normal(k_nrm, (2, 3, 16, 16), jnp.bfloat16)    # NCHW
    Hs = jax.random.normal(k_h, (2, 1, 16, 16), jnp.bfloat16)         # NCHW

    params = init_params(k_par, images.shape, norms.shape, Hs.shape,
                         img_feat=32, norm_feat=32, h_feat=16,
                         hidden_sizes=(64, 64, 32), out_features=2)
    packed, meta = prepare_params(params)

    out = stain_fusion_forward(images, norms, Hs, packed, meta)
    out = jax.block_until_ready(out)
    assert out.shape == (2, 2) and out.dtype == jnp.float32

    ref = reference_forward(images, norms, Hs, params)
    assert jnp.allclose(out, ref, rtol=1e-1, atol=3e-2), (out, ref)
    print("KERNEL_OK")
</pallas_src>

<mosaic_0001>
module attributes {stable_mosaic.version = 11 : i64} {
  func.func @kernel(%arg0: i32, %arg1: memref<8x768xbf16, #tpu.memory_space<vmem>>, %arg2: memref<8x768xbf16, #tpu.memory_space<vmem>>, %arg3: memref<8x256xbf16, #tpu.memory_space<vmem>>, %arg4: memref<768x128xbf16, #tpu.memory_space<vmem>>, %arg5: memref<768x128xbf16, #tpu.memory_space<vmem>>, %arg6: memref<256x128xbf16, #tpu.memory_space<vmem>>, %arg7: memref<256x128xbf16, #tpu.memory_space<vmem>>, %arg8: memref<8x128xf32, #tpu.memory_space<vmem>>, %arg9: memref<8x128xbf16, #tpu.memory_space<vmem>>) attributes {dimension_semantics = [#tpu.dimension_semantics<parallel>], iteration_bounds = array<i64: 1>, scalar_prefetch = 0 : i64, scratch_operands = 0 : i64, tpu.core_type = #tpu.core_type<tc>, window_params = [{transform_indices = @transform_0, window_bounds = array<i64: 8, 768>}, {transform_indices = @transform_1, window_bounds = array<i64: 8, 768>}, {transform_indices = @transform_2, window_bounds = array<i64: 8, 256>}, {pipeline_mode = #tpu.pipeline_mode<synchronous>, transform_indices = @transform_3, window_bounds = array<i64: 768, 128>}, {pipeline_mode = #tpu.pipeline_mode<synchronous>, transform_indices = @transform_4, window_bounds = array<i64: 768, 128>}, {pipeline_mode = #tpu.pipeline_mode<synchronous>, transform_indices = @transform_5, window_bounds = array<i64: 256, 128>}, {pipeline_mode = #tpu.pipeline_mode<synchronous>, transform_indices = @transform_6, window_bounds = array<i64: 256, 128>}, {pipeline_mode = #tpu.pipeline_mode<synchronous>, transform_indices = @transform_7, window_bounds = array<i64: 8, 128>}, {transform_indices = @transform_8, window_bounds = array<i64: 8, 128>}]} {
    %c0 = arith.constant 0 : index
    %c0_0 = arith.constant 0 : index
    %0 = vector.load %arg1[%c0, %c0_0] : memref<8x768xbf16, #tpu.memory_space<vmem>>, vector<8x768xbf16>
    %c0_1 = arith.constant 0 : index
    %c0_2 = arith.constant 0 : index
    %1 = vector.load %arg4[%c0_1, %c0_2] : memref<768x128xbf16, #tpu.memory_space<vmem>>, vector<768x128xbf16>
    %cst = arith.constant dense<0.000000e+00> : vector<8x128xf32>
    %2 = tpu.matmul %0, %1, %cst {dimension_numbers = #tpu.dot_dimension_numbers<[1], [0], [0], [1], [0, 0, 1, 1], [], []>} : vector<8x768xbf16>, vector<768x128xbf16>, vector<8x128xf32> -> vector<8x128xf32>
    %c0_3 = arith.constant 0 : index
    %c0_4 = arith.constant 0 : index
    %3 = vector.load %arg2[%c0_3, %c0_4] : memref<8x768xbf16, #tpu.memory_space<vmem>>, vector<8x768xbf16>
    %c0_5 = arith.constant 0 : index
    %c0_6 = arith.constant 0 : index
    %4 = vector.load %arg5[%c0_5, %c0_6] : memref<768x128xbf16, #tpu.memory_space<vmem>>, vector<768x128xbf16>
    %cst_7 = arith.constant dense<0.000000e+00> : vector<8x128xf32>
    %5 = tpu.matmul %3, %4, %cst_7 {dimension_numbers = #tpu.dot_dimension_numbers<[1], [0], [0], [1], [0, 0, 1, 1], [], []>} : vector<8x768xbf16>, vector<768x128xbf16>, vector<8x128xf32> -> vector<8x128xf32>
    %6 = arith.addf %2, %5 : vector<8x128xf32>
    %c0_8 = arith.constant 0 : index
    %c0_9 = arith.constant 0 : index
    %7 = vector.load %arg3[%c0_8, %c0_9] : memref<8x256xbf16, #tpu.memory_space<vmem>>, vector<8x256xbf16>
    %c0_10 = arith.constant 0 : index
    %c0_11 = arith.constant 0 : index
    %8 = vector.load %arg6[%c0_10, %c0_11] : memref<256x128xbf16, #tpu.memory_space<vmem>>, vector<256x128xbf16>
    %cst_12 = arith.constant dense<0.000000e+00> : vector<8x128xf32>
    %9 = tpu.matmul %7, %8, %cst_12 {dimension_numbers = #tpu.dot_dimension_numbers<[1], [0], [0], [1], [0, 0, 1, 1], [], []>} : vector<8x256xbf16>, vector<256x128xbf16>, vector<8x128xf32> -> vector<8x128xf32>
    %10 = arith.addf %6, %9 : vector<8x128xf32>
    %c0_13 = arith.constant 0 : index
    %c0_14 = arith.constant 0 : index
    %11 = vector.load %arg8[%c0_13, %c0_14] : memref<8x128xf32, #tpu.memory_space<vmem>>, vector<1x128xf32>
    %12 = vector.broadcast %11 : vector<1x128xf32> to vector<8x128xf32>
    %13 = arith.addf %10, %12 : vector<8x128xf32>
    %cst_15 = arith.constant 0.000000e+00 : f32
    %14 = vector.broadcast %cst_15 : f32 to vector<8x128xf32>
    %15 = arith.maximumf %13, %14 : vector<8x128xf32>
    %c0_16 = arith.constant 0 : index
    %c0_17 = arith.constant 0 : index
    %16 = vector.load %arg7[%c0_16, %c0_17] : memref<256x128xbf16, #tpu.memory_space<vmem>>, vector<128x128xbf16>
    %c1 = arith.constant 1 : index
    %c0_18 = arith.constant 0 : index
    %17 = vector.load %arg8[%c1, %c0_18] : memref<8x128xf32, #tpu.memory_space<vmem>>, vector<1x128xf32>
    %18 = arith.truncf %15 : vector<8x128xf32> to vector<8x128xbf16>
    %cst_19 = arith.constant dense<0.000000e+00> : vector<8x128xf32>
    %19 = tpu.matmul %18, %16, %cst_19 {dimension_numbers = #tpu.dot_dimension_numbers<[1], [0], [0], [1], [0, 0, 1, 1], [], []>} : vector<8x128xbf16>, vector<128x128xbf16>, vector<8x128xf32> -> vector<8x128xf32>
    %20 = vector.broadcast %17 : vector<1x128xf32> to vector<8x128xf32>
    %21 = arith.addf %19, %20 : vector<8x128xf32>
    %cst_20 = arith.constant 0.000000e+00 : f32
    %22 = vector.broadcast %cst_20 : f32 to vector<8x128xf32>
    %23 = arith.maximumf %21, %22 : vector<8x128xf32>
    %c128 = arith.constant 128 : index
    %c0_21 = arith.constant 0 : index
    %24 = vector.load %arg7[%c128, %c0_21] : memref<256x128xbf16, #tpu.memory_space<vmem>>, vector<128x128xbf16>
    %c2 = arith.constant 2 : index
    %c0_22 = arith.constant 0 : index
    %25 = vector.load %arg8[%c2, %c0_22] : memref<8x128xf32, #tpu.memory_space<vmem>>, vector<1x128xf32>
    %26 = arith.truncf %23 : vector<8x128xf32> to vector<8x128xbf16>
    %cst_23 = arith.constant dense<0.000000e+00> : vector<8x128xf32>
    %27 = tpu.matmul %26, %24, %cst_23 {dimension_numbers = #tpu.dot_dimension_numbers<[1], [0], [0], [1], [0, 0, 1, 1], [], []>} : vector<8x128xbf16>, vector<128x128xbf16>, vector<8x128xf32> -> vector<8x128xf32>
    %28 = vector.broadcast %25 : vector<1x128xf32> to vector<8x128xf32>
    %29 = arith.addf %27, %28 : vector<8x128xf32>
    %30 = arith.truncf %29 : vector<8x128xf32> to vector<8x128xbf16>
    %c0_24 = arith.constant 0 : index
    %c0_25 = arith.constant 0 : index
    %31 = vector.load %arg9[%c0_24, %c0_25] : memref<8x128xbf16, #tpu.memory_space<vmem>>, vector<8x128xbf16>
    tpu.vector_store %arg9[%c0_24, %c0_25], %30 {strides = array<i32>} : memref<8x128xbf16, #tpu.memory_space<vmem>>, vector<8x128xbf16>,
    return
  }
  func.func @transform_0(%arg0: i32) -> (i32, i32) {
    %c0_i32 = arith.constant 0 : i32
    %c0_i32_0 = arith.constant 0 : i32
    return %arg0, %c0_i32 : i32, i32
  }
  func.func @transform_1(%arg0: i32) -> (i32, i32) {
    %c0_i32 = arith.constant 0 : i32
    %c0_i32_0 = arith.constant 0 : i32
    return %arg0, %c0_i32 : i32, i32
  }
  func.func @transform_2(%arg0: i32) -> (i32, i32) {
    %c0_i32 = arith.constant 0 : i32
    %c0_i32_0 = arith.constant 0 : i32
    return %arg0, %c0_i32 : i32, i32
  }
  func.func @transform_3(%arg0: i32) -> (i32, i32) {
    %c0_i32 = arith.constant 0 : i32
    %c0_i32_0 = arith.constant 0 : i32
    %c0_i32_1 = arith.constant 0 : i32
    return %c0_i32, %c0_i32_0 : i32, i32
  }
  func.func @transform_4(%arg0: i32) -> (i32, i32) {
    %c0_i32 = arith.constant 0 : i32
    %c0_i32_0 = arith.constant 0 : i32
    %c0_i32_1 = arith.constant 0 : i32
    return %c0_i32, %c0_i32_0 : i32, i32
  }
  func.func @transform_5(%arg0: i32) -> (i32, i32) {
    %c0_i32 = arith.constant 0 : i32
    %c0_i32_0 = arith.constant 0 : i32
    %c0_i32_1 = arith.constant 0 : i32
    return %c0_i32, %c0_i32_0 : i32, i32
  }
  func.func @transform_6(%arg0: i32) -> (i32, i32) {
    %c0_i32 = arith.constant 0 : i32
    %c0_i32_0 = arith.constant 0 : i32
    %c0_i32_1 = arith.constant 0 : i32
    return %c0_i32, %c0_i32_0 : i32, i32
  }
  func.func @transform_7(%arg0: i32) -> (i32, i32) {
    %c0_i32 = arith.constant 0 : i32
    %c0_i32_0 = arith.constant 0 : i32
    %c0_i32_1 = arith.constant 0 : i32
    return %c0_i32, %c0_i32_0 : i32, i32
  }
  func.func @transform_8(%arg0: i32) -> (i32, i32) {
    %c0_i32 = arith.constant 0 : i32
    %c0_i32_0 = arith.constant 0 : i32
    return %arg0, %c0_i32 : i32, i32
  }
}

</mosaic_0001>

<bundles_post_ra>
// kernel: tpu_custom_call.1
= control target key start
LH: loop header
LB: loop body
LE: loop exit
PB: predicated region body
PF: predicated region fallthrough
CT: control target
= control target key end

     0   :  { %13 = vsyncpa [#allocation3], 0  ;;  %s2447_s0 = inlined_call_operand.hbm [shape: bf16[8,768], index: 0, kind: input, shape index: {}]   ;;  %s2448_s1 = inlined_call_operand.hbm [shape: bf16[8,768], index: 1, kind: input, shape index: {}]   ;;  %s2449_s2 = inlined_call_operand.hbm [shape: bf16[8,256], index: 2, kind: input, shape index: {}]   ;;  %s2450_s3 = inlined_call_operand.hbm [shape: bf16[768,128], index: 3, kind: input, shape index: {}]   ;;  %s2451_s4 = inlined_call_operand.hbm [shape: bf16[768,128], index: 4, kind: input, shape index: {}]   ;;  %s2452_s5 = inlined_call_operand.hbm [shape: bf16[256,128], index: 5, kind: input, shape index: {}]   ;;  %s2453_s6 = inlined_call_operand.hbm [shape: bf16[256,128], index: 6, kind: input, shape index: {}]   ;;  %s2454_s7 = inlined_call_operand.hbm [shape: f32[8,128], index: 7, kind: input, shape index: {}]   ;;  %s2455_s8 = inlined_call_operand.hbm [shape: bf16[8,128], index: 8, kind: output, shape index: {}]  }
   0x1   :  { %14 = vsyncpa [#allocation6], 0 }
   0x2   :  { %15 = vsyncpa [#allocation9], 0 }
   0x3   :  { %16 = vsyncpa [#allocation12], 0 }
   0x4   :  { %17 = vsyncpa [#allocation15], 0  ;;  %s35_s29 = sshll.u32 %s2448_s1, 4  ;;  %s36_s29 = int_to_ptr.hbm [resolvable:$true] %s35_s29 }
   0x5   :  { %18 = vsyncpa [#allocation4], 0  ;;  %s2352_s30 = smov [#allocation5]   ;;  %s56_s12 = sshll.u32 %s2450_s3, 4  ;;  %s57_s12 = int_to_ptr.hbm [resolvable:$true] %s56_s12 }
   0x6   :  { %s37_s9 = sshll.u32 %s2352_s30, 4  ;;  %s2353_s13 = smov [#allocation8]   ;;  %s38_s9 = int_to_ptr.vmem [resolvable:$true] %s37_s9 }
   0x7   :  { %40 = dma.hbm_to_vmem [thread:$0]  %s36_s29, 384, %s38_s9, [#allocation6]  }
   0x8   :  { %s58_s14 = sshll.u32 %s2353_s13, 4  ;;  %s2354_s15 = smov 64   ;;  %s59_s14 = int_to_ptr.vmem [resolvable:$true] %s58_s14 }
   0x9   :  { %s2355_s16 = smov 4   ;;  %s82_s18 = sshll.u32 %s2452_s5, 4  ;;  %s83_s18 = int_to_ptr.hbm [resolvable:$true] %s82_s18 }
   0xa   :  { %64 = dma.hbm_to_vmem [thread:$0]  %s57_s12, 6144, %s59_s14, [#allocation9], %s2354_s15, %s2354_s15, %s2355_s16  }
   0xb   :  { %s2356_s19 = smov [#allocation11]   ;;  %s24_s22 = sshll.u32 %s2447_s0, 4  ;;  %s25_s22 = int_to_ptr.hbm [resolvable:$true] %s24_s22 }
   0xc   :  { %s84_s20 = sshll.u32 %s2356_s19, 4  ;;  %s2357_s23 = smov [#allocation2]   ;;  %s85_s20 = int_to_ptr.vmem [resolvable:$true] %s84_s20 }
   0xd   :  { %90 = dma.hbm_to_vmem [thread:$0]  %s83_s18, 2048, %s85_s20, [#allocation12], %s2354_s15, %s2354_s15, %s2355_s16  }
   0xe   :  { %s26_s24 = sshll.u32 %s2357_s23, 4  ;;  %s46_s27 = sshll.u32 %s2449_s2, 4  ;;  %s27_s24 = int_to_ptr.vmem [resolvable:$true] %s26_s24  ;;  %s47_s27 = int_to_ptr.hbm [resolvable:$true] %s46_s27 }
   0xf   :  { %29 = dma.hbm_to_vmem [thread:$0]  %s25_s22, 384, %s27_s24, [#allocation3]  }
  0x10   :  { %s69_s29 = sshll.u32 %s2451_s4, 4  ;;  %s2358_s30 = smov [#allocation7]   ;;  %s70_s29 = int_to_ptr.hbm [resolvable:$true] %s69_s29 }
  0x11   :  { %s48_s0 = sshll.u32 %s2358_s30, 4  ;;  %s2359_s9 = smov [#allocation10]   ;;  %s49_s0 = int_to_ptr.vmem [resolvable:$true] %s48_s0 }
  0x12   :  { %51 = dma.hbm_to_vmem [thread:$0]  %s47_s27, 128, %s49_s0, [#allocation6]  }
  0x13   :  { %s71_s10 = sshll.u32 %s2359_s9, 4  ;;  %s95_s13 = sshll.u32 %s2453_s6, 4  ;;  %s72_s10 = int_to_ptr.vmem [resolvable:$true] %s71_s10  ;;  %s96_s13 = int_to_ptr.hbm [resolvable:$true] %s95_s13 }
  0x14   :  { %77 = dma.hbm_to_vmem [thread:$0]  %s70_s29, 6144, %s72_s10, [#allocation9], %s2354_s15, %s2354_s15, %s2355_s16  }
  0x15   :  { %s109_s4 = sshll.u32 %s2454_s7, 4  ;;  %s2360_s1 = smov [#allocation13]   ;;  %s110_s4 = int_to_ptr.hbm [resolvable:$true] %s109_s4 }
  0x16   :  { %s97_s17 = sshll.u32 %s2360_s1, 4  ;;  %s2361_s18 = smov [#allocation14]   ;;  %s98_s17 = int_to_ptr.vmem [resolvable:$true] %s97_s17 }
  0x17   :  { %103 = dma.hbm_to_vmem [thread:$0]  %s96_s13, 2048, %s98_s17, [#allocation12], %s2354_s15, %s2354_s15, %s2355_s16  }
  0x18   :  { %s111_s6 = sshll.u32 %s2361_s18, 4  ;;  %s112_s6 = int_to_ptr.vmem [resolvable:$true] %s111_s6 }
  0x19   :  { %114 = dma.hbm_to_vmem [thread:$0]  %s110_s4, 128, %s112_s6, [#allocation15]  }
  0x1a   :  { %2340 = dma.done.wait [#allocation3], 384  }
  0x1b   :  { %2341 = vsyncadd [#allocation3], 4294966912 }
  0x1c   :  { %2342 = dma.done.wait [#allocation6], 512  }
  0x1d   :  { %2343 = vsyncadd [#allocation6], 4294966784 }
  0x1e   :  { %2344 = dma.done.wait [#allocation9], 12288  }
  0x1f   :  { %2345 = vsyncadd [#allocation9], 4294955008 }
  0x20   :  { %2346 = dma.done.wait [#allocation12], 4096  }
  0x21   :  { %2347 = vsyncadd [#allocation12], 4294963200 }
  0x22   :  { %2348 = dma.done.wait [#allocation15], 128  }
  0x23   :  { %2349 = vsyncadd [#allocation15], 4294967168  ;;  %v2037_v0 = vld [vmem:[#allocation10 + $0x38] sm:$0xff]  ;;  %v2036_v4 = vld [vmem:[#allocation10 + $0x30] sm:$0xff]  ;;  %s2362_s7 = smov [#allocation16]   ;;  %s1456_s20 = sshll.u32 %s2455_s8, 4  ;;  %s1457_s20 = int_to_ptr.hbm [resolvable:$true] %s1456_s20 }
  0x24   :  { %v2045_v1 = vld [vmem:[#allocation10 + $0x78] sm:$0xff]  ;;  %654 = vmatpush.bf16.msra.mxu0 %v2037_v0  ;;  %v2044_v5 = vld [vmem:[#allocation10 + $0x70] sm:$0xff]  ;;  %v2035_v8 = vld [vmem:[#allocation10 + $0x28] sm:$0xff]  ;;  %s1454_s15 = sshll.u32 %s2362_s7, 4  ;;  %s1455_s15 = int_to_ptr.vmem [resolvable:$true] %s1454_s15 }
  0x25   :  { %v2053_v2 = vld [vmem:[#allocation10 + $0xb8] sm:$0xff]  ;;  %667 = vmatpush.bf16.msra.mxu1 %v2045_v1  ;;  %v2052_v6 = vld [vmem:[#allocation10 + $0xb0] sm:$0xff]  ;;  %v2043_v9 = vld [vmem:[#allocation10 + $0x68] sm:$0xff] }
  0x26   :  { %v2061_v3 = vld [vmem:[#allocation10 + $0xf8] sm:$0xff]  ;;  %680 = vmatpush.bf16.msra.mxu2 %v2053_v2  ;;  %v2060_v7 = vld [vmem:[#allocation10 + $0xf0] sm:$0xff]  ;;  %v2051_v10 = vld [vmem:[#allocation10 + $0xa8] sm:$0xff] }
  0x27   :  { %693 = vmatpush.bf16.msra.mxu3 %v2061_v3  ;;  %v2059_v11 = vld [vmem:[#allocation10 + $0xe8] sm:$0xff]  ;;  %v2034_v12 = vld [vmem:[#allocation10 + $0x20] sm:$0xff]  ;;  %v2033_v16 = vld [vmem:[#allocation10 + $0x18] sm:$0xff] }
  0x28   :  { %655 = vmatpush.bf16.msra.mxu0 %v2036_v4  ;;  %v2042_v13 = vld [vmem:[#allocation10 + $0x60] sm:$0xff]  ;;  %v2041_v17 = vld [vmem:[#allocation10 + $0x58] sm:$0xff]  ;;  %v2032_v20 = vld [vmem:[#allocation10 + $0x10] sm:$0xff] }
  0x29   :  { %668 = vmatpush.bf16.msra.mxu1 %v2044_v5  ;;  %v2050_v14 = vld [vmem:[#allocation10 + $0xa0] sm:$0xff]  ;;  %v2049_v18 = vld [vmem:[#allocation10 + $0x98] sm:$0xff]  ;;  %v2040_v21 = vld [vmem:[#allocation10 + $0x50] sm:$0xff] }
  0x2a   :  { %681 = vmatpush.bf16.msra.mxu2 %v2052_v6  ;;  %v2058_v15 = vld [vmem:[#allocation10 + $0xe0] sm:$0xff]  ;;  %v2057_v19 = vld [vmem:[#allocation10 + $0xd8] sm:$0xff]  ;;  %v2048_v22 = vld [vmem:[#allocation10 + $0x90] sm:$0xff] }
  0x2b   :  { %694 = vmatpush.bf16.msra.mxu3 %v2060_v7  ;;  %v2056_v23 = vld [vmem:[#allocation10 + $0xd0] sm:$0xff]  ;;  %v2031_v24 = vld [vmem:[#allocation10 + $0x8] sm:$0xff]  ;;  %v246_v26 = vld [vmem:[#allocation5] sm:$0xff] }
  0x2c   :  { %656 = vmatpush.bf16.msra.mxu0 %v2035_v8  ;;  %v2039_v25 = vld [vmem:[#allocation10 + $0x48] sm:$0xff]  ;;  %v348_v30 = vunpack.c.l.b16 %v246_v26  ;;  %v2030_v31 = vld [vmem:[#allocation10] sm:$0xff]  ;;  %v2069_v35 = vld [vmem:[#allocation10 + $0x138] sm:$0xff]  ;;  %v349_v36 = vunpack.c.h.b16 %v246_v26 }
  0x2d   :  { %669 = vmatpush.bf16.msra.mxu1 %v2043_v9  ;;  %v2047_v27 = vld [vmem:[#allocation10 + $0x88] sm:$0xff]  ;;  %v2038_v32 = vld [vmem:[#allocation10 + $0x40] sm:$0xff]  ;;  %v2077_v37 = vld [vmem:[#allocation10 + $0x178] sm:$0xff] }
  0x2e   :  { %682 = vmatpush.bf16.msra.mxu2 %v2051_v10  ;;  %v2055_v28 = vld [vmem:[#allocation10 + $0xc8] sm:$0xff]  ;;  %v2046_v34 = vld [vmem:[#allocation10 + $0x80] sm:$0xff]  ;;  %v1989_v38 = vld [vmem:[#allocation8 + $0x38] sm:$0xff]  ;;  %v354_v40 = vpack.c.b16 %v348_v30, %v348_v30  ;;  %v355_v45 = vpack.c.b16 %v349_v36, %v349_v36 }
  0x2f   :  { %695 = vmatpush.bf16.msra.mxu3 %v2059_v11  ;;  %v247_v29 = vld [vmem:[#allocation5 + $0x8] sm:$0xff]  ;;  %v2054_v39 = vld [vmem:[#allocation10 + $0xc0] sm:$0xff]  ;;  %v1997_v42 = vld [vmem:[#allocation8 + $0x78] sm:$0xff] }
  0x30   :  { %657 = vmatpush.bf16.msra.mxu0 %v2034_v12  ;;  %v350_v33 = vunpack.c.l.b16 %v247_v29  ;;  %v351_v41 = vunpack.c.h.b16 %v247_v29  ;;  %v2068_v44 = vld [vmem:[#allocation10 + $0x130] sm:$0xff]  ;;  %v2067_v50 = vld [vmem:[#allocation10 + $0x128] sm:$0xff]  ;;  %v2066_v54 = vld [vmem:[#allocation10 + $0x120] sm:$0xff] }
  0x31   :  { %670 = vmatpush.bf16.msra.mxu1 %v2042_v13  ;;  %v2076_v46 = vld [vmem:[#allocation10 + $0x170] sm:$0xff]  ;;  %v2075_v51 = vld [vmem:[#allocation10 + $0x168] sm:$0xff]  ;;  %v2074_v55 = vld [vmem:[#allocation10 + $0x160] sm:$0xff] }
  0x32   :  { %683 = vmatpush.bf16.msra.mxu2 %v2050_v14  ;;  %v356_v43 = vpack.c.b16 %v350_v33, %v350_v33  ;;  %v1988_v47 = vld [vmem:[#allocation8 + $0x30] sm:$0xff]  ;;  %v357_v48 = vpack.c.b16 %v351_v41, %v351_v41  ;;  %v1987_v52 = vld [vmem:[#allocation8 + $0x28] sm:$0xff]  ;;  %v1986_v56 = vld [vmem:[#allocation8 + $0x20] sm:$0xff] }
  0x33   :  { %696 = vmatpush.bf16.msra.mxu3 %v2058_v15  ;;  %v1996_v49 = vld [vmem:[#allocation8 + $0x70] sm:$0xff]  ;;  %v1995_v53 = vld [vmem:[#allocation8 + $0x68] sm:$0xff]  ;;  %v1994_v57 = vld [vmem:[#allocation8 + $0x60] sm:$0xff] }
  0x34   :  { %658 = vmatpush.bf16.msra.mxu0 %v2033_v16  ;;  %v2065_v58 = vld [vmem:[#allocation10 + $0x118] sm:$0xff]  ;;  %v2064_v62 = vld [vmem:[#allocation10 + $0x110] sm:$0xff]  ;;  %v2063_v2 = vld [vmem:[#allocation10 + $0x108] sm:$0xff] }
  0x35   :  { %671 = vmatpush.bf16.msra.mxu1 %v2041_v17  ;;  %v2073_v59 = vld [vmem:[#allocation10 + $0x158] sm:$0xff]  ;;  %v2072_v63 = vld [vmem:[#allocation10 + $0x150] sm:$0xff]  ;;  %v2071_v3 = vld [vmem:[#allocation10 + $0x148] sm:$0xff] }
  0x36   :  { %684 = vmatpush.bf16.msra.mxu2 %v2049_v18  ;;  %v1985_v60 = vld [vmem:[#allocation8 + $0x18] sm:$0xff]  ;;  %v1984_v0 = vld [vmem:[#allocation8 + $0x10] sm:$0xff]  ;;  %v1983_v4 = vld [vmem:[#allocation8 + $0x8] sm:$0xff] }
  0x37   :  { %697 = vmatpush.bf16.msra.mxu3 %v2057_v19  ;;  %v1993_v61 = vld [vmem:[#allocation8 + $0x58] sm:$0xff]  ;;  %v1992_v1 = vld [vmem:[#allocation8 + $0x50] sm:$0xff]  ;;  %v147_v5 = vld [vmem:[#allocation2] sm:$0xff] }
  0x38   :  { %659 = vmatpush.bf16.msra.mxu0 %v2032_v20  ;;  %v248_v6 = vld [vmem:[#allocation5 + $0x10] sm:$0xff]  ;;  %v1991_v7 = vld [vmem:[#allocation8 + $0x48] sm:$0xff]  ;;  %v2062_v8 = vld [vmem:[#allocation10 + $0x100] sm:$0xff]  ;;  %v735_v9 = vunpack.c.l.b16 %v147_v5  ;;  %v736_v18 = vunpack.c.h.b16 %v147_v5 }
  0x39   :  { %672 = vmatpush.bf16.msra.mxu1 %v2040_v21  ;;  %v2070_v10 = vld [vmem:[#allocation10 + $0x140] sm:$0xff]  ;;  %v352_v12 = vunpack.c.l.b16 %v248_v6  ;;  %v353_v13 = vunpack.c.h.b16 %v248_v6  ;;  %v2005_v14 = vld [vmem:[#allocation8 + $0xb8] sm:$0xff]  ;;  %v2011_v29 = vld [vmem:[#allocation8 + $0xe8] sm:$0xff] }
  0x3a   :  { %685 = vmatpush.bf16.msra.mxu2 %v2048_v22  ;;  %v1982_v11 = vld [vmem:[#allocation8] sm:$0xff]  ;;  %v2013_v15 = vld [vmem:[#allocation8 + $0xf8] sm:$0xff]  ;;  %v741_v20 = vpack.c.b16 %v735_v9, %v735_v9  ;;  %v742_v26 = vpack.c.b16 %v736_v18, %v736_v18  ;;  %v2019_v30 = vld [vmem:[#allocation8 + $0x128] sm:$0xff] }
  0x3b   :  { %698 = vmatpush.bf16.msra.mxu3 %v2056_v23  ;;  %v2021_v16 = vld [vmem:[#allocation8 + $0x138] sm:$0xff]  ;;  %v1990_v17 = vld [vmem:[#allocation8 + $0x40] sm:$0xff]  ;;  %v358_v21 = vpack.c.b16 %v352_v12, %v352_v12  ;;  %v359_v22 = vpack.c.b16 %v353_v13, %v353_v13  ;;  %v2004_v23 = vld [vmem:[#allocation8 + $0xb0] sm:$0xff] }
  0x3c   :  { %660 = vmatpush.bf16.msra.mxu0 %v2031_v24  ;;  %v2029_v19 = vld [vmem:[#allocation8 + $0x178] sm:$0xff]  ;;  %v2012_v24 = vld [vmem:[#allocation8 + $0xf0] sm:$0xff]  ;;  %v2010_v33 = vld [vmem:[#allocation8 + $0xe0] sm:$0xff] }
  0x3d   :  { %673 = vmatpush.bf16.msra.mxu1 %v2039_v25  ;;  %v2020_v25 = vld [vmem:[#allocation8 + $0x130] sm:$0xff]  ;;  %v2001_v36 = vld [vmem:[#allocation8 + $0x98] sm:$0xff]  ;;  %v2090_v5 = vld [vmem:[#allocation11 + $0x60] sm:$0xff] }
  0x3e   :  { %686 = vmatpush.bf16.msra.mxu2 %v2047_v27  ;;  %v2028_v27 = vld [vmem:[#allocation8 + $0x170] sm:$0xff]  ;;  %v2081_v6 = vld [vmem:[#allocation11 + $0x18] sm:$0xff]  ;;  %v2087_v12 = vld [vmem:[#allocation11 + $0x48] sm:$0xff] }
  0x3f   :  { %699 = vmatpush.bf16.msra.mxu3 %v2055_v28  ;;  %v2003_v28 = vld [vmem:[#allocation8 + $0xa8] sm:$0xff]  ;;  %v2008_v41 = vld [vmem:[#allocation8 + $0xd0] sm:$0xff] }
  0x40   :  { %661 = vmatpush.bf16.msra.mxu0 %v2030_v31  ;;  %v2027_v31 = vld [vmem:[#allocation8 + $0x168] sm:$0xff]  ;;  %v2088_v9 = vld [vmem:[#allocation11 + $0x50] sm:$0xff] }
  0x41   :  { %674 = vmatpush.bf16.msra.mxu1 %v2038_v32  ;;  %v2002_v32 = vld [vmem:[#allocation8 + $0xa0] sm:$0xff] }
  0x42   :  { %687 = vmatpush.bf16.msra.mxu2 %v2046_v34  ;;  %v2018_v34 = vld [vmem:[#allocation8 + $0x120] sm:$0xff] }
  0x43   :  { %700 = vmatpush.bf16.msra.mxu3 %v2054_v39  ;;  %662 = vmatmul.bf16.vlgmr.msra.gmra.mxu0 %v354_v40  ;;  %v2025_v39 = vld [vmem:[#allocation8 + $0x158] sm:$0xff]  ;;  %v2000_v40 = vld [vmem:[#allocation8 + $0x90] sm:$0xff] }
  0x44   :  { %706 = vmatpush.bf16.msrb.mxu0 %v2069_v35  ;;  %675 = vmatmul.bf16.vlgmr.msra.gmra.mxu1 %v355_v45  ;;  %v2026_v35 = vld [vmem:[#allocation8 + $0x160] sm:$0xff]  ;;  %v2007_v45 = vld [vmem:[#allocation8 + $0xc8] sm:$0xff] }
  0x45   :  { %719 = vmatpush.bf16.msrb.mxu1 %v2077_v37  ;;  %688 = vmatmul.bf16.vlgmr.msra.gmra.mxu2 %v356_v43  ;;  %v2009_v37 = vld [vmem:[#allocation8 + $0xd8] sm:$0xff]  ;;  %v2024_v43 = vld [vmem:[#allocation8 + $0x150] sm:$0xff] }
  0x46   :  { %1041 = vmatpush.bf16.msrb.mxu2 %v1989_v38  ;;  %701 = vmatmul.bf16.vlgmr.msra.gmra.mxu3 %v357_v48  ;;  %v2017_v38 = vld [vmem:[#allocation8 + $0x118] sm:$0xff] }
  0x47   :  { %1054 = vmatpush.bf16.msrb.mxu3 %v1997_v42  ;;  %v2016_v42 = vld [vmem:[#allocation8 + $0x110] sm:$0xff]  ;;  %v149_v48 = vld [vmem:[#allocation2 + $0x10] sm:$0xff] }
  0x48   :  { %707 = vmatpush.bf16.msrb.mxu0 %v2068_v44  ;;  %v1999_v44 = vld [vmem:[#allocation8 + $0x88] sm:$0xff] }
  0x49   :  { %720 = vmatpush.bf16.msrb.mxu1 %v2076_v46  ;;  %v148_v46 = vld [vmem:[#allocation2 + $0x8] sm:$0xff] }
  0x4a   :  { %1042 = vmatpush.bf16.msrb.mxu2 %v1988_v47  ;;  %v2015_v47 = vld [vmem:[#allocation8 + $0x108] sm:$0xff] }
  0x4b   :  { %1055 = vmatpush.bf16.msrb.mxu3 %v1996_v49  ;;  %v2023_v49 = vld [vmem:[#allocation8 + $0x148] sm:$0xff] }
  0x4c   :  { %708 = vmatpush.bf16.msrb.mxu0 %v2067_v50  ;;  %v737_v50 = vunpack.c.l.b16 %v148_v46 }
  0x4d   :  { %721 = vmatpush.bf16.msrb.mxu1 %v2075_v51  ;;  %v738_v51 = vunpack.c.h.b16 %v148_v46 }
  0x4e   :  { %1043 = vmatpush.bf16.msrb.mxu2 %v1987_v52  ;;  %v1998_v52 = vld [vmem:[#allocation8 + $0x80] sm:$0xff] }
  0x4f   :  { %1056 = vmatpush.bf16.msrb.mxu3 %v1995_v53  ;;  %v2006_v53 = vld [vmem:[#allocation8 + $0xc0] sm:$0xff] }
  0x50   :  { %709 = vmatpush.bf16.msrb.mxu0 %v2066_v54  ;;  %v739_v54 = vunpack.c.l.b16 %v149_v48 }
  0x51   :  { %722 = vmatpush.bf16.msrb.mxu1 %v2074_v55  ;;  %v2014_v55 = vld [vmem:[#allocation8 + $0x100] sm:$0xff] }
  0x52   :  { %1044 = vmatpush.bf16.msrb.mxu2 %v1986_v56  ;;  %v2085_v56 = vld [vmem:[#allocation11 + $0x38] sm:$0xff] }
  0x53   :  { %1057 = vmatpush.bf16.msrb.mxu3 %v1994_v57  ;;  %v740_v57 = vunpack.c.h.b16 %v149_v48 }
  0x54   :  { %710 = vmatpush.bf16.msrb.mxu0 %v2065_v58  ;;  %v2093_v58 = vld [vmem:[#allocation11 + $0x78] sm:$0xff] }
  0x55   :  { %723 = vmatpush.bf16.msrb.mxu1 %v2073_v59  ;;  %v2022_v59 = vld [vmem:[#allocation8 + $0x140] sm:$0xff] }
  0x56   :  { %1045 = vmatpush.bf16.msrb.mxu2 %v1985_v60  ;;  %v743_v60 = vpack.c.b16 %v737_v50, %v737_v50 }
  0x57   :  { %1058 = vmatpush.bf16.msrb.mxu3 %v1993_v61  ;;  %v744_v61 = vpack.c.b16 %v738_v51, %v738_v51 }
  0x58   :  { %711 = vmatpush.bf16.msrb.mxu0 %v2064_v62  ;;  %v745_v62 = vpack.c.b16 %v739_v54, %v739_v54 }
  0x59   :  { %724 = vmatpush.bf16.msrb.mxu1 %v2072_v63  ;;  %v746_v63 = vpack.c.b16 %v740_v57, %v740_v57 }
  0x5a   :  { %1046 = vmatpush.bf16.msrb.mxu2 %v1984_v0  ;;  %v2084_v0 = vld [vmem:[#allocation11 + $0x30] sm:$0xff] }
  0x5b   :  { %1059 = vmatpush.bf16.msrb.mxu3 %v1992_v1  ;;  %v2092_v1 = vld [vmem:[#allocation11 + $0x70] sm:$0xff] }
  0x5c   :  { %712 = vmatpush.bf16.msrb.mxu0 %v2063_v2  ;;  %v2083_v2 = vld [vmem:[#allocation11 + $0x28] sm:$0xff] }
  0x5d   :  { %725 = vmatpush.bf16.msrb.mxu1 %v2071_v3  ;;  %v2091_v3 = vld [vmem:[#allocation11 + $0x68] sm:$0xff] }
  0x5e   :  { %1047 = vmatpush.bf16.msrb.mxu2 %v1983_v4  ;;  %v2082_v4 = vld [vmem:[#allocation11 + $0x20] sm:$0xff] }
  0x5f   :  { %1060 = vmatpush.bf16.msrb.mxu3 %v1991_v7  ;;  %v2089_v7 = vld [vmem:[#allocation11 + $0x58] sm:$0xff] }
  0x60   :  { %713 = vmatpush.bf16.msrb.mxu0 %v2062_v8  ;;  %v2080_v8 = vld [vmem:[#allocation11 + $0x10] sm:$0xff] }
  0x61   :  { %726 = vmatpush.bf16.msrb.mxu1 %v2070_v10  ;;  %v2079_v10 = vld [vmem:[#allocation11 + $0x8] sm:$0xff] }
  0x62   :  { %1048 = vmatpush.bf16.msrb.mxu2 %v1982_v11  ;;  %v1119_v11 = vld [vmem:[#allocation7] sm:$0xff] }
  0x63   :  { %1061 = vmatpush.bf16.msrb.mxu3 %v1990_v17  ;;  %714 = vmatmul.bf16.vlgmr.msrb.gmra.mxu0 %v358_v21  ;;  %v1153_v13 = vunpack.c.l.b16 %v1119_v11 }
  0x64   :  { %1067 = vmatpush.bf16.msra.mxu0 %v2005_v14  ;;  %727 = vmatmul.bf16.vlgmr.msrb.gmra.mxu1 %v359_v22  ;;  %v2078_v14 = vld [vmem:[#allocation11] sm:$0xff] }
  0x65   :  { %1080 = vmatpush.bf16.msra.mxu1 %v2013_v15  ;;  %1049 = vmatmul.bf16.vlgmr.msrb.gmra.mxu2 %v741_v20  ;;  %v1154_v15 = vunpack.c.h.b16 %v1119_v11  ;;  %v1155_v17 = vpack.c.b16 %v1153_v13, %v1153_v13 }
  0x66   :  { %1093 = vmatpush.bf16.msra.mxu2 %v2021_v16  ;;  %1062 = vmatmul.bf16.vlgmr.msrb.gmra.mxu3 %v742_v26  ;;  %v2086_v16 = vld [vmem:[#allocation11 + $0x40] sm:$0xff] }
  0x67   :  { %1106 = vmatpush.bf16.msra.mxu3 %v2029_v19  ;;  %v1156_v18 = vpack.c.b16 %v1154_v15, %v1154_v15  ;;  %v2102_v15 = vld [vmem:[#allocation13 + $0x40] sm:$0xff] }
  0x68   :  { %1068 = vmatpush.bf16.msra.mxu0 %v2004_v23 }
  0x69   :  { %1081 = vmatpush.bf16.msra.mxu1 %v2012_v24 }
  0x6a   :  { %1094 = vmatpush.bf16.msra.mxu2 %v2020_v25 }
  0x6b   :  { %1107 = vmatpush.bf16.msra.mxu3 %v2028_v27 }
  0x6c   :  { %1069 = vmatpush.bf16.msra.mxu0 %v2003_v28 }
  0x6d   :  { %1082 = vmatpush.bf16.msra.mxu1 %v2011_v29 }
  0x6e   :  { %1095 = vmatpush.bf16.msra.mxu2 %v2019_v30 }
  0x6f   :  { %1108 = vmatpush.bf16.msra.mxu3 %v2027_v31  ;;  %v2101_v31 = vld [vmem:[#allocation13 + $0x38] sm:$0xff] }
  0x70   :  { %1070 = vmatpush.bf16.msra.mxu0 %v2002_v32 }
  0x71   :  { %1083 = vmatpush.bf16.msra.mxu1 %v2010_v33  ;;  %v2100_v33 = vld [vmem:[#allocation13 + $0x30] sm:$0xff] }
  0x72   :  { %1096 = vmatpush.bf16.msra.mxu2 %v2018_v34 }
  0x73   :  { %1109 = vmatpush.bf16.msra.mxu3 %v2026_v35 }
  0x74   :  { %1071 = vmatpush.bf16.msra.mxu0 %v2001_v36 }
  0x75   :  { %1084 = vmatpush.bf16.msra.mxu1 %v2009_v37  ;;  %v2099_v37 = vld [vmem:[#allocation13 + $0x28] sm:$0xff] }
  0x76   :  { %1097 = vmatpush.bf16.msra.mxu2 %v2017_v38 }
  0x77   :  { %1110 = vmatpush.bf16.msra.mxu3 %v2025_v39  ;;  %v2098_v39 = vld [vmem:[#allocation13 + $0x20] sm:$0xff] }
  0x78   :  { %1072 = vmatpush.bf16.msra.mxu0 %v2000_v40 }
  0x79   :  { %1085 = vmatpush.bf16.msra.mxu1 %v2008_v41  ;;  %v2097_v41 = vld [vmem:[#allocation13 + $0x18] sm:$0xff] }
  0x7a   :  { %1098 = vmatpush.bf16.msra.mxu2 %v2016_v42  ;;  %v2096_v42 = vld [vmem:[#allocation13 + $0x10] sm:$0xff] }
  0x7b   :  { %1111 = vmatpush.bf16.msra.mxu3 %v2024_v43 }
  0x7c   :  { %1073 = vmatpush.bf16.msra.mxu0 %v1999_v44  ;;  %v2095_v44 = vld [vmem:[#allocation13 + $0x8] sm:$0xff] }
  0x7d   :  { %1086 = vmatpush.bf16.msra.mxu1 %v2007_v45 }
  0x7e   :  { %1099 = vmatpush.bf16.msra.mxu2 %v2015_v47  ;;  %v2094_v47 = vld [vmem:[#allocation13] sm:$0xff] }
  0x7f   :  { %1112 = vmatpush.bf16.msra.mxu3 %v2023_v49 }
  0x80   :  { %1074 = vmatpush.bf16.msra.mxu0 %v1998_v52 }
  0x81   :  { %1087 = vmatpush.bf16.msra.mxu1 %v2006_v53  ;;  %v2109_v53 = vld [vmem:[#allocation13 + $0x78] sm:$0xff] }
  0x82   :  { %1100 = vmatpush.bf16.msra.mxu2 %v2014_v55  ;;  %v2108_v55 = vld [vmem:[#allocation13 + $0x70] sm:$0xff] }
  0x83   :  { %1113 = vmatpush.bf16.msra.mxu3 %v2022_v59  ;;  %1075 = vmatmul.bf16.vlgmr.msra.gmra.mxu0 %v743_v60 }
  0x84   :  { %1255 = vmatpush.bf16.msrb.mxu0 %v2085_v56  ;;  %1088 = vmatmul.bf16.vlgmr.msra.gmra.mxu1 %v744_v61  ;;  %v2106_v61 = vld [vmem:[#allocation13 + $0x60] sm:$0xff] }
  0x85   :  { %1268 = vmatpush.bf16.msrb.mxu1 %v2093_v58  ;;  %1101 = vmatmul.bf16.vlgmr.msra.gmra.mxu2 %v745_v62  ;;  %v2107_v58 = vld [vmem:[#allocation13 + $0x68] sm:$0xff] }
  0x86   :  { %1114 = vmatmul.bf16.vlgmr.msra.gmra.mxu3 %v746_v63  ;;  %1353 = vmatpush.bf16.msrb.mxu2 %v2101_v31  ;;  %v2105_v63 = vld [vmem:[#allocation13 + $0x58] sm:$0xff] }
  0x87   :  { %1434 = vmatpush.bf16.msrb.mxu3 %v2109_v53 }
  0x88   :  { %1256 = vmatpush.bf16.msrb.mxu0 %v2084_v0 }
  0x89   :  { %1269 = vmatpush.bf16.msrb.mxu1 %v2092_v1 }
  0x8a   :  { %1354 = vmatpush.bf16.msrb.mxu2 %v2100_v33 }
  0x8b   :  { %1435 = vmatpush.bf16.msrb.mxu3 %v2108_v55 }
  0x8c   :  { %1257 = vmatpush.bf16.msrb.mxu0 %v2083_v2  ;;  %v2104_v2 = vld [vmem:[#allocation13 + $0x50] sm:$0xff] }
  0x8d   :  { %1270 = vmatpush.bf16.msrb.mxu1 %v2091_v3 }
  0x8e   :  { %1355 = vmatpush.bf16.msrb.mxu2 %v2099_v37 }
  0x8f   :  { %1436 = vmatpush.bf16.msrb.mxu3 %v2107_v58 }
  0x90   :  { %1258 = vmatpush.bf16.msrb.mxu0 %v2082_v4 }
  0x91   :  { %1271 = vmatpush.bf16.msrb.mxu1 %v2090_v5 }
  0x92   :  { %1356 = vmatpush.bf16.msrb.mxu2 %v2098_v39 }
  0x93   :  { %1437 = vmatpush.bf16.msrb.mxu3 %v2106_v61 }
  0x94   :  { %1259 = vmatpush.bf16.msrb.mxu0 %v2081_v6 }
  0x95   :  { %1272 = vmatpush.bf16.msrb.mxu1 %v2089_v7  ;;  %v2121_v7 = vld [vmem:[#allocation14] ss:$0 sm:$0xff] }
  0x96   :  { %1357 = vmatpush.bf16.msrb.mxu2 %v2097_v41 }
  0x97   :  { %1438 = vmatpush.bf16.msrb.mxu3 %v2105_v63 }
  0x98   :  { %1260 = vmatpush.bf16.msrb.mxu0 %v2080_v8 }
  0x99   :  { %1273 = vmatpush.bf16.msrb.mxu1 %v2088_v9 }
  0x9a   :  { %1358 = vmatpush.bf16.msrb.mxu2 %v2096_v42 }
  0x9b   :  { %1439 = vmatpush.bf16.msrb.mxu3 %v2104_v2 }
  0x9c   :  { %1261 = vmatpush.bf16.msrb.mxu0 %v2079_v10 }
  0x9d   :  { %1274 = vmatpush.bf16.msrb.mxu1 %v2087_v12 }
  0x9e   :  { %1359 = vmatpush.bf16.msrb.mxu2 %v2095_v44 }
  0xa0   :  { %1262 = vmatpush.bf16.msrb.mxu0 %v2078_v14  ;;  %v2103_v14 = vld [vmem:[#allocation13 + $0x48] sm:$0xff] }
  0xa1   :  { %1275 = vmatpush.bf16.msrb.mxu1 %v2086_v16  ;;  %1440 = vmatpush.bf16.msrb.mxu3 %v2103_v14  ;;  %v2122_v16 = vld [vmem:[#allocation14 + $0x1] ss:$0 sm:$0xff] }
  0xa2   :  { %1360 = vmatpush.bf16.msrb.mxu2 %v2094_v47 }
  0xa3   :  { %1263 = vmatmul.bf16.vlgmr.msrb.gmra.mxu0 %v1155_v17 }
  0xa4   :  { %1276 = vmatmul.bf16.vlgmr.msrb.gmra.mxu1 %v1156_v18 }
  0xa5   :  { %1441 = vmatpush.bf16.msrb.mxu3 %v2102_v15 }
  0xc0   :  { %v663_v19 = vpop.f32.mrf.mxu0 }
  0xc1   :  { %v676_v20 = vpop.f32.mrf.mxu1 }
  0xc2   :  { %v677_v21 = vadd.f32 %v676_v20, %v663_v19 }
  0xc8   :  { %v689_v22 = vpop.f32.mrf.mxu2  ;;  %v665_v24 = vpop.f32.mrf.mxu0 }
  0xc9   :  { %v690_v23 = vadd.f32 %v689_v22, %v677_v21  ;;  %v702_v25 = vpop.f32.mrf.mxu3  ;;  %v678_v26 = vpop.f32.mrf.mxu1  ;;  %v2123_v22 = vld [vmem:[#allocation14 + $0x2] ss:$0 sm:$0xff] }
  0xcb   :  { %v703_v46 = vadd.f32 %v702_v25, %v690_v23 }
  0xd0   :  { %v691_v27 = vpop.f32.mrf.mxu2 }
  0xd1   :  { %v704_v28 = vpop.f32.mrf.mxu3 }
  0xe0   :  { %v715_v29 = vpop.f32.mrf.mxu0 }
  0xe1   :  { %v728_v30 = vpop.f32.mrf.mxu1  ;;  %v716_v48 = vadd.f32 %v715_v29, %v703_v46 }
  0xe3   :  { %v729_v54 = vadd.f32 %v728_v30, %v716_v48 }
  0xe8   :  { %v1050_v32 = vpop.f32.mrf.mxu2  ;;  %v717_v35 = vpop.f32.mrf.mxu0 }
  0xe9   :  { %v1063_v34 = vpop.f32.mrf.mxu3  ;;  %v730_v36 = vpop.f32.mrf.mxu1  ;;  %v1051_v56 = vadd.f32 %v1050_v32, %v729_v54 }
  0xeb   :  { %v1064_v60 = vadd.f32 %v1063_v34, %v1051_v56 }
  0xf0   :  { %v1052_v38 = vpop.f32.mrf.mxu2 }
  0xf1   :  { %v1065_v40 = vpop.f32.mrf.mxu3 }
 0x100   :  { %v1076_v43 = vpop.f32.mrf.mxu0 }
 0x101   :  { %v1089_v45 = vpop.f32.mrf.mxu1  ;;  %v1077_v62 = vadd.f32 %v1076_v43, %v1064_v60 }
 0x103   :  { %v1090_v0 = vadd.f32 %v1089_v45, %v1077_v62 }
 0x108   :  { %v1102_v49 = vpop.f32.mrf.mxu2  ;;  %v1078_v51 = vpop.f32.mrf.mxu0 }
 0x109   :  { %v1115_v50 = vpop.f32.mrf.mxu3  ;;  %v1091_v52 = vpop.f32.mrf.mxu1  ;;  %v1103_v1 = vadd.f32 %v1102_v49, %v1090_v0 }
 0x10b   :  { %v1116_v5 = vadd.f32 %v1115_v50, %v1103_v1 }
 0x110   :  { %v1104_v57 = vpop.f32.mrf.mxu2 }
 0x111   :  { %v1117_v59 = vpop.f32.mrf.mxu3 }
 0x120   :  { %v1264_v3 = vpop.f32.mrf.mxu0 }
 0x121   :  { %v1277_v4 = vpop.f32.mrf.mxu1 }
 0x122   :  { %v1278_v6 = vadd.f32 %v1277_v4, %v1264_v3 }
 0x124   :  { %v1281_v8 = vadd.f32 %v1278_v6, %v1116_v5 }
 0x126   :  { %v1284_v9 = vadd.f32 %v2121_v7, %v1281_v8 }
 0x128   :  { %v1285_v10 = vmax.f32 %v1284_v9, 0.0  ;;  %v1266_v11 = vpop.f32.mrf.mxu0 }
 0x129   :  { %v1279_v12 = vpop.f32.mrf.mxu1 }
 0x12a   :  { %v1303_v13 = vpack.c.bf16 %v1285_v10, %v1285_v10 }
 0x12c   :  { %1361 = vmatmul.bf16.vlgmr.msrb.gmra.mxu2 %v1303_v13 }
 0x1af   :  { %v1362_v17 = vpop.f32.mrf.mxu2 }
 0x1b0   :  { %v1363_v18 = vadd.f32 %v2122_v16, %v1362_v17 }
 0x1b2   :  { %v1366_v19 = vmax.f32 %v1363_v18, 0.0 }
 0x1b4   :  { %v1384_v20 = vpack.c.bf16 %v1366_v19, %v1366_v19 }
 0x1b6   :  { %1442 = vmatmul.bf16.vlgmr.msrb.gmra.mxu3 %v1384_v20 }
 0x1b7   :  { %v1364_v21 = vpop.f32.mrf.mxu2 }
 0x239   :  { %v1443_v23 = vpop.f32.mrf.mxu3 }
 0x23a   :  { %v1444_v24 = vadd.f32 %v2123_v22, %v1443_v23 }
 0x23c   :  { %v1447_v25 = vpack.c.bf16 %v1444_v24, %v1444_v24 }
 0x23e   :  { %1448 = vst [vmem:[#allocation16] sm:$0xf] %v1447_v25 }
 0x23f   :  { %1459 = dma.vmem_to_hbm [thread:$0]  %s1455_s15, 64, %s1457_s20, [#allocation4]  }
 0x241   :  { %v1445_v26 = vpop.f32.mrf.mxu3 }
 0x242   :  { %2350 = dma.done.wait [#allocation4], 64  }
 0x243   :  { %2351 = vsyncadd [#allocation4], 4294967232 }
 0x244   :  { %1464 = vsyncpa [#allocation3], 1 }
 0x245   :  { %1465 = vsyncpa [#allocation6], 1 }
 0x246   :  { %1466 = vsyncpa [#allocation9], 1 }
 0x247   :  { %1467 = vsyncpa [#allocation12], 1 }
 0x248   :  { %1468 = vsyncpa [#allocation15], 1 }
 0x249   :  { %1469 = vsyncpa [#allocation4], 1 }

</bundles_post_ra>
